<compile_context>
chip_gen: v7x
topology: tpu7x:2x2x1
jax: 0.10.0
libtpu: 0.0.40
codegen_flags: <defaults>
</compile_context>

<pallas_src>
import jax
import jax.numpy as jnp
from jax.experimental import pallas as pl
from jax.experimental.pallas import tpu as pltpu

_LANE = 128                       # vreg lane width (last dim)
_TILE_BYTES = 4 * 1024 * 1024     # ~4 MiB per buffer per grid step
_VMEM_LIMIT = 40 * 1024 * 1024    # 4 buffers x 4 MiB ~= 16 MiB + headroom


def _min_sublanes(dtype) -> int:
    # Native sublane tiling: 8 rows for 4-byte, 16 for 2-byte, 32 for 1-byte.
    return max(8, 32 // jnp.dtype(dtype).itemsize)


def _row_tile(dtype) -> int:
    rows = _TILE_BYTES // (_LANE * jnp.dtype(dtype).itemsize)
    sub = _min_sublanes(dtype)
    return max(sub, (rows // sub) * sub)


def _h_swish_kernel(x_ref, o_ref):
    # x_ref / o_ref: (tile_rows, 128) VMEM blocks.
    x = x_ref[...].astype(jnp.float32)   # no-op for f32; keeps bf16 safe on v5e
    # relu6(x + 3) / 6  ->  clamp to [0, 6], multiply by 1/6 (no divide).
    gate = jnp.clip(x + 3.0, 0.0, 6.0) * (1.0 / 6.0)
    o_ref[...] = (x * gate).astype(o_ref.dtype)


def _run_slab(slab):
    """Run h_swish over a lane-dense (rows, 128) slab."""
    rows, _ = slab.shape
    dtype = slab.dtype
    tile = _row_tile(dtype)
    # Small inputs: one block equal to the full array dims (always legal).
    # Large inputs: fixed multi-MiB tiles; a partial last block is masked.
    tile_rows = rows if rows <= tile else tile
    grid = (pl.cdiv(rows, tile_rows),)
    return pl.pallas_call(
        _h_swish_kernel,
        out_shape=jax.ShapeDtypeStruct((rows, _LANE), dtype),
        grid=grid,
        in_specs=[pl.BlockSpec((tile_rows, _LANE), lambda i: (i, 0))],
        out_specs=pl.BlockSpec((tile_rows, _LANE), lambda i: (i, 0)),
        compiler_params=pltpu.CompilerParams(
            dimension_semantics=("parallel",),
            vmem_limit_bytes=_VMEM_LIMIT,
        ),
    )(slab)


@jax.jit
def h_swish(x):
    """h_swish(x) = x * relu6(x + 3) / 6, elementwise, any shape/float dtype."""
    n = x.size
    if n == 0:
        return x

    if n % _LANE == 0:
        # Zero-copy fast path: pure metadata reshape to (rows, 128).
        rows = n // _LANE
        out = _run_slab(x.reshape(rows, _LANE))
        return out.reshape(x.shape)

    # Rare fallback: numel not a multiple of 128 -> tail-only pad to the next
    # lane multiple (one small pad + one tail slice; rows are never padded).
    flat = x.reshape(-1)
    pad = (-n) % _LANE
    flat = jnp.pad(flat, (0, pad))
    rows = (n + pad) // _LANE
    out = _run_slab(flat.reshape(rows, _LANE))
    return out.reshape(-1)[:n].reshape(x.shape)


if __name__ == "__main__":
    key = jax.random.PRNGKey(0)
    # Small NCHW activation tensor consistent with the module.
    N, C, H, W = 2, 4, 16, 16
    x = jax.random.normal(key, (N, C, H, W), jnp.float32) * 4.0  # hit both clamp edges

    y = jax.block_until_ready(h_swish(x))

    ref = x * jnp.clip(x + 3.0, 0.0, 6.0) / 6.0
    assert y.shape == x.shape
    assert y.dtype == x.dtype
    assert bool(jnp.all(jnp.isfinite(y)))
    assert bool(jnp.allclose(y, ref, atol=1e-6, rtol=1e-6))

    # Exercise the unaligned-tail fallback path once (numel % 128 != 0).
    x2 = jax.random.normal(jax.random.PRNGKey(1), (3, 5, 7), jnp.float32) * 4.0
    y2 = jax.block_until_ready(h_swish(x2))
    ref2 = x2 * jnp.clip(x2 + 3.0, 0.0, 6.0) / 6.0
    assert bool(jnp.allclose(y2, ref2, atol=1e-6, rtol=1e-6))

    # Exercise bf16 (per-dtype sublane rounding) with a looser tolerance.
    xb = x.astype(jnp.bfloat16)
    yb = jax.block_until_ready(h_swish(xb))
    refb = (xb.astype(jnp.float32) * jnp.clip(xb.astype(jnp.float32) + 3.0, 0.0, 6.0) / 6.0)
    assert yb.dtype == jnp.bfloat16
    assert bool(jnp.allclose(yb.astype(jnp.float32), refb, atol=0.1, rtol=0.02))

    print("KERNEL_OK")
</pallas_src>

<mosaic_0001>
module attributes {stable_mosaic.version = 11 : i64} {
  func.func @_h_swish_kernel(%arg0: i32, %arg1: memref<16x128xf32, #tpu.memory_space<vmem>>, %arg2: memref<16x128xf32, #tpu.memory_space<vmem>>) attributes {dimension_semantics = [#tpu.dimension_semantics<parallel>], iteration_bounds = array<i64: 1>, scalar_prefetch = 0 : i64, scratch_operands = 0 : i64, tpu.core_type = #tpu.core_type<tc>, window_params = [{transform_indices = @transform_0, window_bounds = array<i64: 16, 128>}, {transform_indices = @transform_1, window_bounds = array<i64: 16, 128>}]} {
    %c0 = arith.constant 0 : index
    %c0_0 = arith.constant 0 : index
    %0 = vector.load %arg1[%c0, %c0_0] : memref<16x128xf32, #tpu.memory_space<vmem>>, vector<16x128xf32>
    %cst = arith.constant 3.000000e+00 : f32
    %1 = vector.broadcast %cst : f32 to vector<16x128xf32>
    %2 = arith.addf %0, %1 : vector<16x128xf32>
    %cst_1 = arith.constant 0.000000e+00 : f32
    %cst_2 = arith.constant 6.000000e+00 : f32
    %3 = vector.broadcast %cst_1 : f32 to vector<16x128xf32>
    %4 = arith.maximumf %3, %2 : vector<16x128xf32>
    %5 = vector.broadcast %cst_2 : f32 to vector<16x128xf32>
    %6 = arith.minimumf %5, %4 : vector<16x128xf32>
    %cst_3 = arith.constant 0.166666672 : f32
    %7 = vector.broadcast %cst_3 : f32 to vector<16x128xf32>
    %8 = arith.mulf %6, %7 : vector<16x128xf32>
    %9 = arith.mulf %0, %8 : vector<16x128xf32>
    %c0_4 = arith.constant 0 : index
    %c0_5 = arith.constant 0 : index
    %10 = vector.load %arg2[%c0_4, %c0_5] : memref<16x128xf32, #tpu.memory_space<vmem>>, vector<16x128xf32>
    tpu.vector_store %arg2[%c0_4, %c0_5], %9 {strides = array<i32>} : memref<16x128xf32, #tpu.memory_space<vmem>>, vector<16x128xf32>,
    return
  }
  func.func @transform_0(%arg0: i32) -> (i32, i32) {
    %c0_i32 = arith.constant 0 : i32
    %c0_i32_0 = arith.constant 0 : i32
    return %arg0, %c0_i32 : i32, i32
  }
  func.func @transform_1(%arg0: i32) -> (i32, i32) {
    %c0_i32 = arith.constant 0 : i32
    %c0_i32_0 = arith.constant 0 : i32
    return %arg0, %c0_i32 : i32, i32
  }
}

</mosaic_0001>

<bundles_post_ra>
// kernel: h_swish.1
= control target key start
LH: loop header
LB: loop body
LE: loop exit
PB: predicated region body
PF: predicated region fallthrough
CT: control target
= control target key end

     0   :  { %s48_s0 = inlined_call_operand.vmem [shape: f32[16,128], index: 0, kind: input, shape index: {}]   ;;  %s49_s1 = inlined_call_operand.vmem [shape: f32[16,128], index: 1, kind: output, shape index: {}]  }
   0x1   :  { %v8_v0 = vld [vmem:[%s48_s0] sm:$0xff]  ;;  %v9_v1 = vld [vmem:[%s48_s0 + $0x8] sm:$0xff] }
   0x2   :  { %v10_v2 = vadd.f32 3.0, %v8_v0  ;;  %v11_v3 = vadd.f32 3.0, %v9_v1 }
   0x4   :  { %v12_v4 = vmax.f32 %v10_v2, 0.0  ;;  %v13_v5 = vmax.f32 %v11_v3, 0.0 }
   0x6   :  { %v14_v6 = vmin.f32 %v12_v4, 6.0  ;;  %v15_v7 = vmin.f32 %v13_v5, 6.0 }
   0x8   :  { %v16_v8 = vmul.f32 0.16666667, %v14_v6  ;;  %v17_v9 = vmul.f32 0.16666667, %v15_v7 }
   0xa   :  { %v18_v10 = vmul.f32 %v16_v8, %v8_v0  ;;  %v19_v11 = vmul.f32 %v17_v9, %v9_v1 }
   0xc   :  { %20 = vst [vmem:[%s49_s1] sm:$0xff] %v18_v10  ;;  %21 = vst [vmem:[%s49_s1 + $0x8] sm:$0xff] %v19_v11 }

</bundles_post_ra>
